<compile_context>
chip_gen: v7x
topology: tpu7x:2x2x1
jax: 0.10.0
libtpu: 0.0.40
codegen_flags: <defaults>
</compile_context>

<pallas_src>
import numpy as np
import jax
import jax.numpy as jnp
from jax.experimental import pallas as pl
from jax.experimental.pallas import tpu as pltpu

_NEG_FILL = -1e30  # finite "-inf" used for padded rows/columns (safe in f32 and bf16)
_T = 3             # (subject, object, predicate)


def _round_up(x, m):
    return ((x + m - 1) // m) * m


def _next_pow2(x):
    return 1 if x <= 1 else 1 << (x - 1).bit_length()


def _pick_tile_n():
    """Generation-tuned lane tile (samples live on the 128-wide lane axis)."""
    try:
        kind = jax.devices()[0].device_kind.lower()
    except Exception:
        return 4096
    if "v5 lite" in kind or "v5e" in kind:
        return 2048     # v5e: 16 MiB scoped-VMEM default, ~0.82 TB/s HBM
    if "v7" in kind:
        return 8192     # v7x: 3.2 TB/s HBM -> amortize per-grid-step overhead
    return 4096         # v6e and others


# ----------------------------- Pallas kernel ------------------------------- #
def _fused_wce_acc_kernel(n_ref, scores_ref, labels_ref, weights_ref, out_ref, acc_ref):
    """Fused weighted cross-entropy + accuracy for T targets, gridded over N.

    n_ref      : SMEM scalar-prefetch, shape (1,) int32 -> true sample count
    scores_ref : [T, C_pad, TILE_N] block, native dtype (classes on sublanes,
                 samples on lanes); padded rows/columns hold _NEG_FILL
    labels_ref : [T, 1, TILE_N] block, int32; padded columns hold -1
    weights_ref: [T, C_pad, 1] f32 (resident); padded class rows hold 0
    out_ref    : [2*T] f32 SMEM -> (loss_t, acc_t) pairs, written on last step
    acc_ref    : [T, 4] f32 SMEM scratch: (sum w*nll, sum w, sum correct, -)
    """
    step = pl.program_id(0)
    last = pl.num_programs(0) - 1
    t, c, tn = scores_ref.shape

    @pl.when(step == 0)
    def _():
        for ti in range(t):
            for k in range(3):
                acc_ref[ti, k] = jnp.float32(0.0)

    # Hoisted out of the static T-unroll (JAX does not CSE iota/broadcast).
    cls_ids = jax.lax.broadcasted_iota(jnp.int32, (c, tn), 0)   # [C, TN]
    cls_ids_f = cls_ids.astype(jnp.float32)

    for ti in range(t):  # static unroll, T == 3
        s = scores_ref[ti].astype(jnp.float32)        # [C, TN]
        y = labels_ref[ti]                            # [1, TN] int32 (-1 on pads)
        w = weights_ref[ti]                           # [C, 1]  f32 (0 on pad rows)

        # numerically-stable log-sum-exp over classes (sublane axis)
        cmax = jnp.max(s, axis=0, keepdims=True)                           # [1, TN]
        lse = jnp.log(jnp.sum(jnp.exp(s - cmax), axis=0, keepdims=True))   # [1, TN]

        onehot = (cls_ids == y).astype(jnp.float32)                        # [C, TN]
        s_y = jnp.sum(onehot * s, axis=0, keepdims=True)   # score at label
        nll = lse + cmax - s_y                             # -log softmax(s)[y]
        w_y = jnp.sum(onehot * w, axis=0, keepdims=True)   # weight at label (0 on pads)

        # first-index argmax (matches jnp/torch-CPU tie semantics).  Padded
        # columns compare against label -1, so they are never "correct" and
        # need no extra mask; padded columns also have w_y == 0 for the loss.
        first_max = jnp.min(
            jnp.where(s == cmax, cls_ids_f, jnp.float32(c)),
            axis=0, keepdims=True)
        correct = (first_max == y.astype(jnp.float32)).astype(jnp.float32)

        acc_ref[ti, 0] += jnp.sum(w_y * nll)
        acc_ref[ti, 1] += jnp.sum(w_y)
        acc_ref[ti, 2] += jnp.sum(correct)

    @pl.when(step == last)
    def _():
        inv_n = jnp.float32(1.0) / n_ref[0].astype(jnp.float32)
        for ti in range(t):
            # NOTE: denominator > 0 is guaranteed because class weights are
            # strictly positive on in-range labels (matches torch semantics).
            out_ref[2 * ti] = acc_ref[ti, 0] / acc_ref[ti, 1]
            out_ref[2 * ti + 1] = acc_ref[ti, 2] * inv_n


# ------------------------------ fused wrapper -------------------------------- #
def _fused_losses(outputs, weights):
    """outputs: list of per-image dicts; weights: [3, Cw, 1] f32 (sbj, obj, prd).

    Returns a (6,) f32 vector:
      [loss_sbj, acc_sbj, loss_obj, acc_obj, loss_prd, acc_prd].
    """
    keys = (("scores_h", "labels_h"), ("scores_o", "labels_o"), ("scores_p", "labels_p"))
    raw = [(jnp.concatenate([o[sk] for o in outputs], axis=0),
            jnp.concatenate([o[lk] for o in outputs], axis=0)) for sk, lk in keys]

    n = raw[0][0].shape[0]
    dtype = raw[0][0].dtype
    c_max = max(max(s.shape[1] for s, _ in raw), weights.shape[1])
    c_pad = _round_up(max(c_max, 8), 8)           # full (8,128)-friendly sublane tiles

    # Lane padding: bucket N to the next power of two (>=128) to limit distinct
    # compilations, then tile it.  Padded columns: scores=_NEG_FILL, label=-1.
    tile_n = _pick_tile_n()
    n_bucket = max(128, _next_pow2(n))
    if n_bucket <= tile_n:
        tile_n = n_bucket
        n_pad = n_bucket
    else:
        n_pad = _round_up(n_bucket, tile_n)

    # Single materialization of the transposed, padded score/label slabs.
    scores_buf = jnp.full((_T, c_pad, n_pad), _NEG_FILL, dtype)
    labels_buf = jnp.full((_T, 1, n_pad), -1, jnp.int32)
    for ti, (s, y) in enumerate(raw):
        scores_buf = jax.lax.dynamic_update_slice(
            scores_buf, s.T.astype(dtype)[None], (ti, 0, 0))
        labels_buf = jax.lax.dynamic_update_slice(
            labels_buf, y.astype(jnp.int32).reshape(1, 1, n), (ti, 0, 0))

    if weights.shape[1] < c_pad:
        weights = jnp.concatenate(
            [weights,
             jnp.zeros((weights.shape[0], c_pad - weights.shape[1], 1), jnp.float32)],
            axis=1)

    n_valid = jnp.array([n], jnp.int32)
    grid = (n_pad // tile_n,)

    return pl.pallas_call(
        _fused_wce_acc_kernel,
        out_shape=jax.ShapeDtypeStruct((2 * _T,), jnp.float32),
        grid_spec=pltpu.PrefetchScalarGridSpec(
            num_scalar_prefetch=1,
            grid=grid,
            in_specs=[
                pl.BlockSpec((_T, c_pad, tile_n), lambda i, n_ref: (0, 0, i)),
                pl.BlockSpec((_T, 1, tile_n), lambda i, n_ref: (0, 0, i)),
                pl.BlockSpec((_T, c_pad, 1), lambda i, n_ref: (0, 0, 0)),
            ],
            out_specs=pl.BlockSpec(memory_space=pltpu.MemorySpace.SMEM),
            scratch_shapes=[pltpu.SMEM((_T, 4), jnp.float32)],
        ),
        compiler_params=pltpu.CompilerParams(
            dimension_semantics=("arbitrary",)),
    )(n_valid, scores_buf, labels_buf, weights)


_fused_losses_jit = jax.jit(_fused_losses)


# --------------------------- SetCriterion (JAX) ----------------------------- #
def get_freq_from_dict(freq_dict, categories):
    freqs = np.zeros(len(categories))
    for i, cat in enumerate(categories):
        freqs[i] = freq_dict.get(cat, 0)
    return freqs


class SetCriterionPallas:
    """JAX/Pallas re-implementation of SetCriterion's forward pass
    (loss_type='weighted_cross_entropy')."""

    def __init__(self, dataset_stat, weight_dict, loss_type="weighted_cross_entropy"):
        self._rank = 0  # no torch.distributed; single host
        self.weight_dict = weight_dict
        self.obj_categories = dataset_stat["obj_categories"]
        self.prd_categories = dataset_stat["prd_categories"]
        self.prd_freq_dict = dataset_stat["prd_freq_dict"]
        self.obj_freq_dict = dataset_stat["obj_freq_dict"]
        self.loss_type = loss_type
        self.prd_weights = None
        self.obj_weights = None
        self._weights_dev = None
        if self.loss_type == "weighted_cross_entropy":
            freq_prd = get_freq_from_dict(self.prd_freq_dict, self.prd_categories) + 1
            freq_obj = get_freq_from_dict(self.obj_freq_dict, self.obj_categories) + 1
            prd_weights = np.sum(freq_prd) / freq_prd
            obj_weights = np.sum(freq_obj) / freq_obj
            self.prd_weights = (prd_weights / np.mean(prd_weights)).astype(np.float32)
            self.obj_weights = (obj_weights / np.mean(obj_weights)).astype(np.float32)
            temp = np.zeros(shape=self.prd_weights.shape[0] + 1, dtype=np.float32)
            temp[1:] = self.prd_weights
            temp[0] = min(self.prd_weights)
            self.prd_weights = temp
            # Hoisted device-constant weight table [3, C_pad, 1]; target order is
            # (subject, object, predicate).  Subject uses obj_weights exactly as
            # the original forward() does.  C is padded to a multiple of 8 with
            # zero rows so kernel reductions run on full (8,128) tiles.
            c_pad = _round_up(
                max(self.obj_weights.shape[0], self.prd_weights.shape[0], 8), 8)
            w = np.zeros((3, c_pad, 1), np.float32)
            w[0, : self.obj_weights.shape[0], 0] = self.obj_weights
            w[1, : self.obj_weights.shape[0], 0] = self.obj_weights
            w[2, : self.prd_weights.shape[0], 0] = self.prd_weights
            self._weights_dev = jnp.asarray(w)

    def _uniform_weights(self, outputs):
        # plain cross-entropy == uniform weights over valid classes
        c_obj = outputs[0]["scores_h"].shape[1]
        c_prd = outputs[0]["scores_p"].shape[1]
        c_pad = _round_up(max(c_obj, c_prd, 8), 8)
        w = np.zeros((3, c_pad, 1), np.float32)
        w[0, :c_obj, 0] = 1.0
        w[1, :c_obj, 0] = 1.0
        w[2, :c_prd, 0] = 1.0
        return jnp.asarray(w)

    def forward(self, outputs, targets=None):
        weights = (self._weights_dev if self._weights_dev is not None
                   else self._uniform_weights(outputs))
        out = _fused_losses_jit(outputs, weights)
        # TODO(synk): the NaN-debugging path (get_nan_idx / ValueError with per-image
        # box/category printout) is host-side error reporting, not ported.
        return dict(loss_sbj=out[0], loss_obj=out[2], loss_prd=out[4],
                    acc_sbj=out[1], acc_obj=out[3], acc_prd=out[5])


# ------------------------------ reference ----------------------------------- #
def _ref_weighted_ce_acc(scores, labels, w):
    scores = jnp.asarray(scores, jnp.float32)
    w = jnp.asarray(w, jnp.float32)
    logp = jax.nn.log_softmax(scores, axis=-1)
    nll = -jnp.take_along_axis(logp, labels[:, None], axis=-1)[:, 0]
    wy = w[labels]
    loss = jnp.sum(wy * nll) / jnp.sum(wy)
    acc = jnp.mean((jnp.argmax(scores, axis=-1) == labels).astype(jnp.float32))
    return loss, acc


# -------------------------------- main --------------------------------------- #
if __name__ == "__main__":
    # Small synthetic "dataset statistics" (deterministic parameter init).
    n_obj_cat, n_prd_cat = 9, 6            # predicate scores have n_prd_cat + 1 classes
    obj_categories = [f"obj_{i}" for i in range(n_obj_cat)]
    prd_categories = [f"prd_{i}" for i in range(n_prd_cat)]
    obj_freq_dict = {c: (i + 1) * 10 for i, c in enumerate(obj_categories)}
    prd_freq_dict = {c: (i + 1) * 5 for i, c in enumerate(prd_categories)}
    dataset_stat = dict(obj_categories=obj_categories, prd_categories=prd_categories,
                        obj_freq_dict=obj_freq_dict, prd_freq_dict=prd_freq_dict)

    criterion = SetCriterionPallas(dataset_stat, weight_dict={},
                                   loss_type="weighted_cross_entropy")

    # Synthetic model outputs: batch of 2 images, 8 (subject, object, predicate)
    # pairs each.
    key = jax.random.PRNGKey(0)
    batch, pairs = 2, 8
    c_obj, c_prd = n_obj_cat, n_prd_cat + 1
    outputs = []
    for b in range(batch):
        key, k1, k2, k3, k4, k5, k6 = jax.random.split(key, 7)
        outputs.append(dict(
            scores_h=jax.random.normal(k1, (pairs, c_obj), jnp.float32),
            labels_h=jax.random.randint(k2, (pairs,), 0, c_obj, jnp.int32),
            scores_o=jax.random.normal(k3, (pairs, c_obj), jnp.float32),
            labels_o=jax.random.randint(k4, (pairs,), 0, c_obj, jnp.int32),
            scores_p=jax.random.normal(k5, (pairs, c_prd), jnp.float32),
            labels_p=jax.random.randint(k6, (pairs,), 0, c_prd, jnp.int32),
        ))

    loss_dict = criterion.forward(outputs)
    loss_dict = jax.tree_util.tree_map(jax.block_until_ready, loss_dict)

    # Verify against a pure-JAX reference of the PyTorch semantics.
    ok = True
    for tgt, w, lk, ak in [("h", criterion.obj_weights, "loss_sbj", "acc_sbj"),
                           ("o", criterion.obj_weights, "loss_obj", "acc_obj"),
                           ("p", criterion.prd_weights, "loss_prd", "acc_prd")]:
        s = jnp.concatenate([o[f"scores_{tgt}"] for o in outputs], axis=0)
        l = jnp.concatenate([o[f"labels_{tgt}"] for o in outputs], axis=0)
        rl, ra = _ref_weighted_ce_acc(s, l, w)
        ok &= bool(jnp.allclose(loss_dict[lk], rl, atol=1e-5, rtol=1e-5))
        ok &= bool(jnp.allclose(loss_dict[ak], ra, atol=1e-6))

    if ok:
        print("KERNEL_OK")
    else:
        print("MISMATCH", {k: float(v) for k, v in loss_dict.items()})
</pallas_src>

<mosaic_0001>
module attributes {stable_mosaic.version = 11 : i64} {
  func.func @_fused_wce_acc_kernel(%arg0: i32, %arg1: memref<1xi32, #tpu.memory_space<smem>>, %arg2: memref<3x16x128xf32, #tpu.memory_space<vmem>>, %arg3: memref<3x1x128xi32, #tpu.memory_space<vmem>>, %arg4: memref<3x16x1xf32, #tpu.memory_space<vmem>>, %arg5: memref<6xf32, #tpu.memory_space<smem>>, %arg6: memref<3x4xf32, #tpu.memory_space<smem>>) attributes {dimension_semantics = [#tpu.dimension_semantics<arbitrary>], iteration_bounds = array<i64: 1>, scalar_prefetch = 1 : i64, scratch_operands = 1 : i64, tpu.core_type = #tpu.core_type<tc>, window_params = [{transform_indices = @transform_0, window_bounds = array<i64: 3, 16, 128>}, {transform_indices = @transform_1, window_bounds = array<i64: 3, 1, 128>}, {pipeline_mode = #tpu.pipeline_mode<synchronous>, transform_indices = @transform_2, window_bounds = array<i64: 3, 16, 1>}, {transform_indices = @transform_3, window_bounds = array<i64: 6>}]} {
    %c0_i32 = arith.constant 0 : i32
    %0 = arith.cmpi eq, %arg0, %c0_i32 : i32
    %1 = arith.extui %0 : i1 to i32
    %c0_i32_0 = arith.constant 0 : i32
    %2 = arith.cmpi ne, %1, %c0_i32_0 : i32
    scf.if %2 {
      %cst_89 = arith.constant 0.000000e+00 : f32
      %c0_90 = arith.constant 0 : index
      %c0_91 = arith.constant 0 : index
      %185 = memref.load %arg6[%c0_90, %c0_91] : memref<3x4xf32, #tpu.memory_space<smem>>
      memref.store %cst_89, %arg6[%c0_90, %c0_91] : memref<3x4xf32, #tpu.memory_space<smem>>
      %cst_92 = arith.constant 0.000000e+00 : f32
      %c0_93 = arith.constant 0 : index
      %c1_94 = arith.constant 1 : index
      %186 = memref.load %arg6[%c0_93, %c1_94] : memref<3x4xf32, #tpu.memory_space<smem>>
      memref.store %cst_92, %arg6[%c0_93, %c1_94] : memref<3x4xf32, #tpu.memory_space<smem>>
      %cst_95 = arith.constant 0.000000e+00 : f32
      %c0_96 = arith.constant 0 : index
      %c2_97 = arith.constant 2 : index
      %187 = memref.load %arg6[%c0_96, %c2_97] : memref<3x4xf32, #tpu.memory_space<smem>>
      memref.store %cst_95, %arg6[%c0_96, %c2_97] : memref<3x4xf32, #tpu.memory_space<smem>>
      %cst_98 = arith.constant 0.000000e+00 : f32
      %c1_99 = arith.constant 1 : index
      %c0_100 = arith.constant 0 : index
      %188 = memref.load %arg6[%c1_99, %c0_100] : memref<3x4xf32, #tpu.memory_space<smem>>
      memref.store %cst_98, %arg6[%c1_99, %c0_100] : memref<3x4xf32, #tpu.memory_space<smem>>
      %cst_101 = arith.constant 0.000000e+00 : f32
      %c1_102 = arith.constant 1 : index
      %c1_103 = arith.constant 1 : index
      %189 = memref.load %arg6[%c1_102, %c1_103] : memref<3x4xf32, #tpu.memory_space<smem>>
      memref.store %cst_101, %arg6[%c1_102, %c1_103] : memref<3x4xf32, #tpu.memory_space<smem>>
      %cst_104 = arith.constant 0.000000e+00 : f32
      %c1_105 = arith.constant 1 : index
      %c2_106 = arith.constant 2 : index
      %190 = memref.load %arg6[%c1_105, %c2_106] : memref<3x4xf32, #tpu.memory_space<smem>>
      memref.store %cst_104, %arg6[%c1_105, %c2_106] : memref<3x4xf32, #tpu.memory_space<smem>>
      %cst_107 = arith.constant 0.000000e+00 : f32
      %c2_108 = arith.constant 2 : index
      %c0_109 = arith.constant 0 : index
      %191 = memref.load %arg6[%c2_108, %c0_109] : memref<3x4xf32, #tpu.memory_space<smem>>
      memref.store %cst_107, %arg6[%c2_108, %c0_109] : memref<3x4xf32, #tpu.memory_space<smem>>
      %cst_110 = arith.constant 0.000000e+00 : f32
      %c2_111 = arith.constant 2 : index
      %c1_112 = arith.constant 1 : index
      %192 = memref.load %arg6[%c2_111, %c1_112] : memref<3x4xf32, #tpu.memory_space<smem>>
      memref.store %cst_110, %arg6[%c2_111, %c1_112] : memref<3x4xf32, #tpu.memory_space<smem>>
      %cst_113 = arith.constant 0.000000e+00 : f32
      %c2_114 = arith.constant 2 : index
      %c2_115 = arith.constant 2 : index
      %193 = memref.load %arg6[%c2_114, %c2_115] : memref<3x4xf32, #tpu.memory_space<smem>>
      memref.store %cst_113, %arg6[%c2_114, %c2_115] : memref<3x4xf32, #tpu.memory_space<smem>>
    } else {
    }
    %3 = tpu.iota {dimensions = array<i32: 0>} : vector<16x128xi32>
    %4 = arith.sitofp %3 : vector<16x128xi32> to vector<16x128xf32>
    %c0 = arith.constant 0 : index
    %c0_1 = arith.constant 0 : index
    %c0_2 = arith.constant 0 : index
    %5 = vector.load %arg2[%c0, %c0_1, %c0_2] : memref<3x16x128xf32, #tpu.memory_space<vmem>>, vector<1x16x128xf32>
    %6 = vector.shape_cast %5 : vector<1x16x128xf32> to vector<16x128xf32>
    %c0_3 = arith.constant 0 : index
    %c0_4 = arith.constant 0 : index
    %c0_5 = arith.constant 0 : index
    %7 = vector.load %arg3[%c0_3, %c0_4, %c0_5] : memref<3x1x128xi32, #tpu.memory_space<vmem>>, vector<1x1x128xi32>
    %8 = vector.shape_cast %7 : vector<1x1x128xi32> to vector<1x128xi32>
    %c0_6 = arith.constant 0 : index
    %c0_7 = arith.constant 0 : index
    %c0_8 = arith.constant 0 : index
    %9 = vector.load %arg4[%c0_6, %c0_7, %c0_8] : memref<3x16x1xf32, #tpu.memory_space<vmem>>, vector<1x16x1xf32>
    %10 = vector.shape_cast %9 : vector<1x16x1xf32> to vector<16x1xf32>
    %cst = arith.constant dense<0xFF800000> : vector<128xf32>
    %11 = vector.multi_reduction <maximumf>, %6, %cst [0] : vector<16x128xf32> to vector<128xf32>
    %12 = vector.shape_cast %11 : vector<128xf32> to vector<1x128xf32>
    %13 = vector.broadcast %12 : vector<1x128xf32> to vector<16x128xf32>
    %14 = arith.subf %6, %13 : vector<16x128xf32>
    %15 = math.exp %14 : vector<16x128xf32>
    %cst_9 = arith.constant dense<0.000000e+00> : vector<128xf32>
    %16 = vector.multi_reduction <add>, %15, %cst_9 [0] : vector<16x128xf32> to vector<128xf32>
    %17 = vector.shape_cast %16 : vector<128xf32> to vector<1x128xf32>
    %18 = math.log %17 : vector<1x128xf32>
    %19 = vector.broadcast %8 : vector<1x128xi32> to vector<16x128xi32>
    %20 = arith.cmpi eq, %3, %19 : vector<16x128xi32>
    %21 = arith.extui %20 : vector<16x128xi1> to vector<16x128xi32>
    %22 = arith.sitofp %21 : vector<16x128xi32> to vector<16x128xf32>
    %23 = arith.mulf %22, %6 : vector<16x128xf32>
    %cst_10 = arith.constant dense<0.000000e+00> : vector<128xf32>
    %24 = vector.multi_reduction <add>, %23, %cst_10 [0] : vector<16x128xf32> to vector<128xf32>
    %25 = vector.shape_cast %24 : vector<128xf32> to vector<1x128xf32>
    %26 = arith.addf %18, %12 : vector<1x128xf32>
    %27 = arith.subf %26, %25 : vector<1x128xf32>
    %28 = vector.broadcast %10 : vector<16x1xf32> to vector<16x128xf32>
    %29 = arith.mulf %22, %28 : vector<16x128xf32>
    %cst_11 = arith.constant dense<0.000000e+00> : vector<128xf32>
    %30 = vector.multi_reduction <add>, %29, %cst_11 [0] : vector<16x128xf32> to vector<128xf32>
    %31 = vector.shape_cast %30 : vector<128xf32> to vector<1x128xf32>
    %32 = vector.broadcast %12 : vector<1x128xf32> to vector<16x128xf32>
    %33 = arith.cmpf oeq, %6, %32 : vector<16x128xf32>
    %cst_12 = arith.constant 1.600000e+01 : f32
    %34 = vector.broadcast %cst_12 : f32 to vector<16x128xf32>
    %35 = arith.select %33, %4, %34 : vector<16x128xi1>, vector<16x128xf32>
    %cst_13 = arith.constant dense<0x7F800000> : vector<128xf32>
    %36 = vector.multi_reduction <minimumf>, %35, %cst_13 [0] : vector<16x128xf32> to vector<128xf32>
    %37 = vector.shape_cast %36 : vector<128xf32> to vector<1x128xf32>
    %38 = arith.sitofp %8 : vector<1x128xi32> to vector<1x128xf32>
    %39 = arith.cmpf oeq, %37, %38 : vector<1x128xf32>
    %40 = arith.extui %39 : vector<1x128xi1> to vector<1x128xi32>
    %41 = arith.sitofp %40 : vector<1x128xi32> to vector<1x128xf32>
    %c0_14 = arith.constant 0 : index
    %c0_15 = arith.constant 0 : index
    %42 = memref.load %arg6[%c0_14, %c0_15] : memref<3x4xf32, #tpu.memory_space<smem>>
    %43 = arith.mulf %31, %27 : vector<1x128xf32>
    %44 = vector.shape_cast %43 : vector<1x128xf32> to vector<1x1x128xf32>
    %cst_16 = arith.constant dense<0.000000e+00> : vector<1xf32>
    %45 = vector.multi_reduction <add>, %44, %cst_16 [1, 2] : vector<1x1x128xf32> to vector<1xf32>
    %46 = vector.shape_cast %45 : vector<1xf32> to vector<1x1x1xf32>
    %47 = vector.extract %46[0, 0, 0] : f32 from vector<1x1x1xf32>
    %48 = arith.addf %42, %47 : f32
    %c0_17 = arith.constant 0 : index
    %c0_18 = arith.constant 0 : index
    %49 = memref.load %arg6[%c0_17, %c0_18] : memref<3x4xf32, #tpu.memory_space<smem>>
    memref.store %48, %arg6[%c0_17, %c0_18] : memref<3x4xf32, #tpu.memory_space<smem>>
    %c0_19 = arith.constant 0 : index
    %c1 = arith.constant 1 : index
    %50 = memref.load %arg6[%c0_19, %c1] : memref<3x4xf32, #tpu.memory_space<smem>>
    %51 = vector.shape_cast %31 : vector<1x128xf32> to vector<1x1x128xf32>
    %cst_20 = arith.constant dense<0.000000e+00> : vector<1xf32>
    %52 = vector.multi_reduction <add>, %51, %cst_20 [1, 2] : vector<1x1x128xf32> to vector<1xf32>
    %53 = vector.shape_cast %52 : vector<1xf32> to vector<1x1x1xf32>
    %54 = vector.extract %53[0, 0, 0] : f32 from vector<1x1x1xf32>
    %55 = arith.addf %50, %54 : f32
    %c0_21 = arith.constant 0 : index
    %c1_22 = arith.constant 1 : index
    %56 = memref.load %arg6[%c0_21, %c1_22] : memref<3x4xf32, #tpu.memory_space<smem>>
    memref.store %55, %arg6[%c0_21, %c1_22] : memref<3x4xf32, #tpu.memory_space<smem>>
    %c0_23 = arith.constant 0 : index
    %c2 = arith.constant 2 : index
    %57 = memref.load %arg6[%c0_23, %c2] : memref<3x4xf32, #tpu.memory_space<smem>>
    %58 = vector.shape_cast %41 : vector<1x128xf32> to vector<1x1x128xf32>
    %cst_24 = arith.constant dense<0.000000e+00> : vector<1xf32>
    %59 = vector.multi_reduction <add>, %58, %cst_24 [1, 2] : vector<1x1x128xf32> to vector<1xf32>
    %60 = vector.shape_cast %59 : vector<1xf32> to vector<1x1x1xf32>
    %61 = vector.extract %60[0, 0, 0] : f32 from vector<1x1x1xf32>
    %62 = arith.addf %57, %61 : f32
    %c0_25 = arith.constant 0 : index
    %c2_26 = arith.constant 2 : index
    %63 = memref.load %arg6[%c0_25, %c2_26] : memref<3x4xf32, #tpu.memory_space<smem>>
    memref.store %62, %arg6[%c0_25, %c2_26] : memref<3x4xf32, #tpu.memory_space<smem>>
    %c1_27 = arith.constant 1 : index
    %c0_28 = arith.constant 0 : index
    %c0_29 = arith.constant 0 : index
    %64 = vector.load %arg2[%c1_27, %c0_28, %c0_29] : memref<3x16x128xf32, #tpu.memory_space<vmem>>, vector<1x16x128xf32>
    %65 = vector.shape_cast %64 : vector<1x16x128xf32> to vector<16x128xf32>
    %c1_30 = arith.constant 1 : index
    %c0_31 = arith.constant 0 : index
    %c0_32 = arith.constant 0 : index
    %66 = vector.load %arg3[%c1_30, %c0_31, %c0_32] : memref<3x1x128xi32, #tpu.memory_space<vmem>>, vector<1x1x128xi32>
    %67 = vector.shape_cast %66 : vector<1x1x128xi32> to vector<1x128xi32>
    %c1_33 = arith.constant 1 : index
    %c0_34 = arith.constant 0 : index
    %c0_35 = arith.constant 0 : index
    %68 = vector.load %arg4[%c1_33, %c0_34, %c0_35] : memref<3x16x1xf32, #tpu.memory_space<vmem>>, vector<1x16x1xf32>
    %69 = vector.shape_cast %68 : vector<1x16x1xf32> to vector<16x1xf32>
    %cst_36 = arith.constant dense<0xFF800000> : vector<128xf32>
    %70 = vector.multi_reduction <maximumf>, %65, %cst_36 [0] : vector<16x128xf32> to vector<128xf32>
    %71 = vector.shape_cast %70 : vector<128xf32> to vector<1x128xf32>
    %72 = vector.broadcast %71 : vector<1x128xf32> to vector<16x128xf32>
    %73 = arith.subf %65, %72 : vector<16x128xf32>
    %74 = math.exp %73 : vector<16x128xf32>
    %cst_37 = arith.constant dense<0.000000e+00> : vector<128xf32>
    %75 = vector.multi_reduction <add>, %74, %cst_37 [0] : vector<16x128xf32> to vector<128xf32>
    %76 = vector.shape_cast %75 : vector<128xf32> to vector<1x128xf32>
    %77 = math.log %76 : vector<1x128xf32>
    %78 = vector.broadcast %67 : vector<1x128xi32> to vector<16x128xi32>
    %79 = arith.cmpi eq, %3, %78 : vector<16x128xi32>
    %80 = arith.extui %79 : vector<16x128xi1> to vector<16x128xi32>
    %81 = arith.sitofp %80 : vector<16x128xi32> to vector<16x128xf32>
    %82 = arith.mulf %81, %65 : vector<16x128xf32>
    %cst_38 = arith.constant dense<0.000000e+00> : vector<128xf32>
    %83 = vector.multi_reduction <add>, %82, %cst_38 [0] : vector<16x128xf32> to vector<128xf32>
    %84 = vector.shape_cast %83 : vector<128xf32> to vector<1x128xf32>
    %85 = arith.addf %77, %71 : vector<1x128xf32>
    %86 = arith.subf %85, %84 : vector<1x128xf32>
    %87 = vector.broadcast %69 : vector<16x1xf32> to vector<16x128xf32>
    %88 = arith.mulf %81, %87 : vector<16x128xf32>
    %cst_39 = arith.constant dense<0.000000e+00> : vector<128xf32>
    %89 = vector.multi_reduction <add>, %88, %cst_39 [0] : vector<16x128xf32> to vector<128xf32>
    %90 = vector.shape_cast %89 : vector<128xf32> to vector<1x128xf32>
    %91 = vector.broadcast %71 : vector<1x128xf32> to vector<16x128xf32>
    %92 = arith.cmpf oeq, %65, %91 : vector<16x128xf32>
    %cst_40 = arith.constant 1.600000e+01 : f32
    %93 = vector.broadcast %cst_40 : f32 to vector<16x128xf32>
    %94 = arith.select %92, %4, %93 : vector<16x128xi1>, vector<16x128xf32>
    %cst_41 = arith.constant dense<0x7F800000> : vector<128xf32>
    %95 = vector.multi_reduction <minimumf>, %94, %cst_41 [0] : vector<16x128xf32> to vector<128xf32>
    %96 = vector.shape_cast %95 : vector<128xf32> to vector<1x128xf32>
    %97 = arith.sitofp %67 : vector<1x128xi32> to vector<1x128xf32>
    %98 = arith.cmpf oeq, %96, %97 : vector<1x128xf32>
    %99 = arith.extui %98 : vector<1x128xi1> to vector<1x128xi32>
    %100 = arith.sitofp %99 : vector<1x128xi32> to vector<1x128xf32>
    %c1_42 = arith.constant 1 : index
    %c0_43 = arith.constant 0 : index
    %101 = memref.load %arg6[%c1_42, %c0_43] : memref<3x4xf32, #tpu.memory_space<smem>>
    %102 = arith.mulf %90, %86 : vector<1x128xf32>
    %103 = vector.shape_cast %102 : vector<1x128xf32> to vector<1x1x128xf32>
    %cst_44 = arith.constant dense<0.000000e+00> : vector<1xf32>
    %104 = vector.multi_reduction <add>, %103, %cst_44 [1, 2] : vector<1x1x128xf32> to vector<1xf32>
    %105 = vector.shape_cast %104 : vector<1xf32> to vector<1x1x1xf32>
    %106 = vector.extract %105[0, 0, 0] : f32 from vector<1x1x1xf32>
    %107 = arith.addf %101, %106 : f32
    %c1_45 = arith.constant 1 : index
    %c0_46 = arith.constant 0 : index
    %108 = memref.load %arg6[%c1_45, %c0_46] : memref<3x4xf32, #tpu.memory_space<smem>>
    memref.store %107, %arg6[%c1_45, %c0_46] : memref<3x4xf32, #tpu.memory_space<smem>>
    %c1_47 = arith.constant 1 : index
    %c1_48 = arith.constant 1 : index
    %109 = memref.load %arg6[%c1_47, %c1_48] : memref<3x4xf32, #tpu.memory_space<smem>>
    %110 = vector.shape_cast %90 : vector<1x128xf32> to vector<1x1x128xf32>
    %cst_49 = arith.constant dense<0.000000e+00> : vector<1xf32>
    %111 = vector.multi_reduction <add>, %110, %cst_49 [1, 2] : vector<1x1x128xf32> to vector<1xf32>
    %112 = vector.shape_cast %111 : vector<1xf32> to vector<1x1x1xf32>
    %113 = vector.extract %112[0, 0, 0] : f32 from vector<1x1x1xf32>
    %114 = arith.addf %109, %113 : f32
    %c1_50 = arith.constant 1 : index
    %c1_51 = arith.constant 1 : index
    %115 = memref.load %arg6[%c1_50, %c1_51] : memref<3x4xf32, #tpu.memory_space<smem>>
    memref.store %114, %arg6[%c1_50, %c1_51] : memref<3x4xf32, #tpu.memory_space<smem>>
    %c1_52 = arith.constant 1 : index
    %c2_53 = arith.constant 2 : index
    %116 = memref.load %arg6[%c1_52, %c2_53] : memref<3x4xf32, #tpu.memory_space<smem>>
    %117 = vector.shape_cast %100 : vector<1x128xf32> to vector<1x1x128xf32>
    %cst_54 = arith.constant dense<0.000000e+00> : vector<1xf32>
    %118 = vector.multi_reduction <add>, %117, %cst_54 [1, 2] : vector<1x1x128xf32> to vector<1xf32>
    %119 = vector.shape_cast %118 : vector<1xf32> to vector<1x1x1xf32>
    %120 = vector.extract %119[0, 0, 0] : f32 from vector<1x1x1xf32>
    %121 = arith.addf %116, %120 : f32
    %c1_55 = arith.constant 1 : index
    %c2_56 = arith.constant 2 : index
    %122 = memref.load %arg6[%c1_55, %c2_56] : memref<3x4xf32, #tpu.memory_space<smem>>
    memref.store %121, %arg6[%c1_55, %c2_56] : memref<3x4xf32, #tpu.memory_space<smem>>
    %c2_57 = arith.constant 2 : index
    %c0_58 = arith.constant 0 : index
    %c0_59 = arith.constant 0 : index
    %123 = vector.load %arg2[%c2_57, %c0_58, %c0_59] : memref<3x16x128xf32, #tpu.memory_space<vmem>>, vector<1x16x128xf32>
    %124 = vector.shape_cast %123 : vector<1x16x128xf32> to vector<16x128xf32>
    %c2_60 = arith.constant 2 : index
    %c0_61 = arith.constant 0 : index
    %c0_62 = arith.constant 0 : index
    %125 = vector.load %arg3[%c2_60, %c0_61, %c0_62] : memref<3x1x128xi32, #tpu.memory_space<vmem>>, vector<1x1x128xi32>
    %126 = vector.shape_cast %125 : vector<1x1x128xi32> to vector<1x128xi32>
    %c2_63 = arith.constant 2 : index
    %c0_64 = arith.constant 0 : index
    %c0_65 = arith.constant 0 : index
    %127 = vector.load %arg4[%c2_63, %c0_64, %c0_65] : memref<3x16x1xf32, #tpu.memory_space<vmem>>, vector<1x16x1xf32>
    %128 = vector.shape_cast %127 : vector<1x16x1xf32> to vector<16x1xf32>
    %cst_66 = arith.constant dense<0xFF800000> : vector<128xf32>
    %129 = vector.multi_reduction <maximumf>, %124, %cst_66 [0] : vector<16x128xf32> to vector<128xf32>
    %130 = vector.shape_cast %129 : vector<128xf32> to vector<1x128xf32>
    %131 = vector.broadcast %130 : vector<1x128xf32> to vector<16x128xf32>
    %132 = arith.subf %124, %131 : vector<16x128xf32>
    %133 = math.exp %132 : vector<16x128xf32>
    %cst_67 = arith.constant dense<0.000000e+00> : vector<128xf32>
    %134 = vector.multi_reduction <add>, %133, %cst_67 [0] : vector<16x128xf32> to vector<128xf32>
    %135 = vector.shape_cast %134 : vector<128xf32> to vector<1x128xf32>
    %136 = math.log %135 : vector<1x128xf32>
    %137 = vector.broadcast %126 : vector<1x128xi32> to vector<16x128xi32>
    %138 = arith.cmpi eq, %3, %137 : vector<16x128xi32>
    %139 = arith.extui %138 : vector<16x128xi1> to vector<16x128xi32>
    %140 = arith.sitofp %139 : vector<16x128xi32> to vector<16x128xf32>
    %141 = arith.mulf %140, %124 : vector<16x128xf32>
    %cst_68 = arith.constant dense<0.000000e+00> : vector<128xf32>
    %142 = vector.multi_reduction <add>, %141, %cst_68 [0] : vector<16x128xf32> to vector<128xf32>
    %143 = vector.shape_cast %142 : vector<128xf32> to vector<1x128xf32>
    %144 = arith.addf %136, %130 : vector<1x128xf32>
    %145 = arith.subf %144, %143 : vector<1x128xf32>
    %146 = vector.broadcast %128 : vector<16x1xf32> to vector<16x128xf32>
    %147 = arith.mulf %140, %146 : vector<16x128xf32>
    %cst_69 = arith.constant dense<0.000000e+00> : vector<128xf32>
    %148 = vector.multi_reduction <add>, %147, %cst_69 [0] : vector<16x128xf32> to vector<128xf32>
    %149 = vector.shape_cast %148 : vector<128xf32> to vector<1x128xf32>
    %150 = vector.broadcast %130 : vector<1x128xf32> to vector<16x128xf32>
    %151 = arith.cmpf oeq, %124, %150 : vector<16x128xf32>
    %cst_70 = arith.constant 1.600000e+01 : f32
    %152 = vector.broadcast %cst_70 : f32 to vector<16x128xf32>
    %153 = arith.select %151, %4, %152 : vector<16x128xi1>, vector<16x128xf32>
    %cst_71 = arith.constant dense<0x7F800000> : vector<128xf32>
    %154 = vector.multi_reduction <minimumf>, %153, %cst_71 [0] : vector<16x128xf32> to vector<128xf32>
    %155 = vector.shape_cast %154 : vector<128xf32> to vector<1x128xf32>
    %156 = arith.sitofp %126 : vector<1x128xi32> to vector<1x128xf32>
    %157 = arith.cmpf oeq, %155, %156 : vector<1x128xf32>
    %158 = arith.extui %157 : vector<1x128xi1> to vector<1x128xi32>
    %159 = arith.sitofp %158 : vector<1x128xi32> to vector<1x128xf32>
    %c2_72 = arith.constant 2 : index
    %c0_73 = arith.constant 0 : index
    %160 = memref.load %arg6[%c2_72, %c0_73] : memref<3x4xf32, #tpu.memory_space<smem>>
    %161 = arith.mulf %149, %145 : vector<1x128xf32>
    %162 = vector.shape_cast %161 : vector<1x128xf32> to vector<1x1x128xf32>
    %cst_74 = arith.constant dense<0.000000e+00> : vector<1xf32>
    %163 = vector.multi_reduction <add>, %162, %cst_74 [1, 2] : vector<1x1x128xf32> to vector<1xf32>
    %164 = vector.shape_cast %163 : vector<1xf32> to vector<1x1x1xf32>
    %165 = vector.extract %164[0, 0, 0] : f32 from vector<1x1x1xf32>
    %166 = arith.addf %160, %165 : f32
    %c2_75 = arith.constant 2 : index
    %c0_76 = arith.constant 0 : index
    %167 = memref.load %arg6[%c2_75, %c0_76] : memref<3x4xf32, #tpu.memory_space<smem>>
    memref.store %166, %arg6[%c2_75, %c0_76] : memref<3x4xf32, #tpu.memory_space<smem>>
    %c2_77 = arith.constant 2 : index
    %c1_78 = arith.constant 1 : index
    %168 = memref.load %arg6[%c2_77, %c1_78] : memref<3x4xf32, #tpu.memory_space<smem>>
    %169 = vector.shape_cast %149 : vector<1x128xf32> to vector<1x1x128xf32>
    %cst_79 = arith.constant dense<0.000000e+00> : vector<1xf32>
    %170 = vector.multi_reduction <add>, %169, %cst_79 [1, 2] : vector<1x1x128xf32> to vector<1xf32>
    %171 = vector.shape_cast %170 : vector<1xf32> to vector<1x1x1xf32>
    %172 = vector.extract %171[0, 0, 0] : f32 from vector<1x1x1xf32>
    %173 = arith.addf %168, %172 : f32
    %c2_80 = arith.constant 2 : index
    %c1_81 = arith.constant 1 : index
    %174 = memref.load %arg6[%c2_80, %c1_81] : memref<3x4xf32, #tpu.memory_space<smem>>
    memref.store %173, %arg6[%c2_80, %c1_81] : memref<3x4xf32, #tpu.memory_space<smem>>
    %c2_82 = arith.constant 2 : index
    %c2_83 = arith.constant 2 : index
    %175 = memref.load %arg6[%c2_82, %c2_83] : memref<3x4xf32, #tpu.memory_space<smem>>
    %176 = vector.shape_cast %159 : vector<1x128xf32> to vector<1x1x128xf32>
    %cst_84 = arith.constant dense<0.000000e+00> : vector<1xf32>
    %177 = vector.multi_reduction <add>, %176, %cst_84 [1, 2] : vector<1x1x128xf32> to vector<1xf32>
    %178 = vector.shape_cast %177 : vector<1xf32> to vector<1x1x1xf32>
    %179 = vector.extract %178[0, 0, 0] : f32 from vector<1x1x1xf32>
    %180 = arith.addf %175, %179 : f32
    %c2_85 = arith.constant 2 : index
    %c2_86 = arith.constant 2 : index
    %181 = memref.load %arg6[%c2_85, %c2_86] : memref<3x4xf32, #tpu.memory_space<smem>>
    memref.store %180, %arg6[%c2_85, %c2_86] : memref<3x4xf32, #tpu.memory_space<smem>>
    %c0_i32_87 = arith.constant 0 : i32
    %182 = arith.cmpi eq, %arg0, %c0_i32_87 : i32
    %183 = arith.extui %182 : i1 to i32
    %c0_i32_88 = arith.constant 0 : i32
    %184 = arith.cmpi ne, %183, %c0_i32_88 : i32
    scf.if %184 {
      %c0_89 = arith.constant 0 : index
      %185 = memref.load %arg1[%c0_89] : memref<1xi32, #tpu.memory_space<smem>>
      %186 = arith.sitofp %185 : i32 to f32
      %cst_90 = arith.constant 1.000000e+00 : f32
      %187 = arith.divf %cst_90, %186 : f32
      %c0_91 = arith.constant 0 : index
      %c0_92 = arith.constant 0 : index
      %188 = memref.load %arg6[%c0_91, %c0_92] : memref<3x4xf32, #tpu.memory_space<smem>>
      %c0_93 = arith.constant 0 : index
      %c1_94 = arith.constant 1 : index
      %189 = memref.load %arg6[%c0_93, %c1_94] : memref<3x4xf32, #tpu.memory_space<smem>>
      %190 = arith.divf %188, %189 : f32
      %c0_95 = arith.constant 0 : index
      %191 = memref.load %arg5[%c0_95] : memref<6xf32, #tpu.memory_space<smem>>
      memref.store %190, %arg5[%c0_95] : memref<6xf32, #tpu.memory_space<smem>>
      %c0_96 = arith.constant 0 : index
      %c2_97 = arith.constant 2 : index
      %192 = memref.load %arg6[%c0_96, %c2_97] : memref<3x4xf32, #tpu.memory_space<smem>>
      %193 = arith.mulf %192, %187 : f32
      %c1_98 = arith.constant 1 : index
      %194 = memref.load %arg5[%c1_98] : memref<6xf32, #tpu.memory_space<smem>>
      memref.store %193, %arg5[%c1_98] : memref<6xf32, #tpu.memory_space<smem>>
      %c1_99 = arith.constant 1 : index
      %c0_100 = arith.constant 0 : index
      %195 = memref.load %arg6[%c1_99, %c0_100] : memref<3x4xf32, #tpu.memory_space<smem>>
      %c1_101 = arith.constant 1 : index
      %c1_102 = arith.constant 1 : index
      %196 = memref.load %arg6[%c1_101, %c1_102] : memref<3x4xf32, #tpu.memory_space<smem>>
      %197 = arith.divf %195, %196 : f32
      %c2_103 = arith.constant 2 : index
      %198 = memref.load %arg5[%c2_103] : memref<6xf32, #tpu.memory_space<smem>>
      memref.store %197, %arg5[%c2_103] : memref<6xf32, #tpu.memory_space<smem>>
      %c1_104 = arith.constant 1 : index
      %c2_105 = arith.constant 2 : index
      %199 = memref.load %arg6[%c1_104, %c2_105] : memref<3x4xf32, #tpu.memory_space<smem>>
      %200 = arith.mulf %199, %187 : f32
      %c3 = arith.constant 3 : index
      %201 = memref.load %arg5[%c3] : memref<6xf32, #tpu.memory_space<smem>>
      memref.store %200, %arg5[%c3] : memref<6xf32, #tpu.memory_space<smem>>
      %c2_106 = arith.constant 2 : index
      %c0_107 = arith.constant 0 : index
      %202 = memref.load %arg6[%c2_106, %c0_107] : memref<3x4xf32, #tpu.memory_space<smem>>
      %c2_108 = arith.constant 2 : index
      %c1_109 = arith.constant 1 : index
      %203 = memref.load %arg6[%c2_108, %c1_109] : memref<3x4xf32, #tpu.memory_space<smem>>
      %204 = arith.divf %202, %203 : f32
      %c4 = arith.constant 4 : index
      %205 = memref.load %arg5[%c4] : memref<6xf32, #tpu.memory_space<smem>>
      memref.store %204, %arg5[%c4] : memref<6xf32, #tpu.memory_space<smem>>
      %c2_110 = arith.constant 2 : index
      %c2_111 = arith.constant 2 : index
      %206 = memref.load %arg6[%c2_110, %c2_111] : memref<3x4xf32, #tpu.memory_space<smem>>
      %207 = arith.mulf %206, %187 : f32
      %c5 = arith.constant 5 : index
      %208 = memref.load %arg5[%c5] : memref<6xf32, #tpu.memory_space<smem>>
      memref.store %207, %arg5[%c5] : memref<6xf32, #tpu.memory_space<smem>>
    } else {
    }
    return
  }
  func.func @transform_0(%arg0: i32, %arg1: memref<1xi32, #tpu.memory_space<smem>>) -> (i32, i32, i32) {
    %c0_i32 = arith.constant 0 : i32
    %c0_i32_0 = arith.constant 0 : i32
    %c0_i32_1 = arith.constant 0 : i32
    return %c0_i32, %c0_i32_0, %arg0 : i32, i32, i32
  }
  func.func @transform_1(%arg0: i32, %arg1: memref<1xi32, #tpu.memory_space<smem>>) -> (i32, i32, i32) {
    %c0_i32 = arith.constant 0 : i32
    %c0_i32_0 = arith.constant 0 : i32
    %c0_i32_1 = arith.constant 0 : i32
    return %c0_i32, %c0_i32_0, %arg0 : i32, i32, i32
  }
  func.func @transform_2(%arg0: i32, %arg1: memref<1xi32, #tpu.memory_space<smem>>) -> (i32, i32, i32) {
    %c0_i32 = arith.constant 0 : i32
    %c0_i32_0 = arith.constant 0 : i32
    %c0_i32_1 = arith.constant 0 : i32
    %c0_i32_2 = arith.constant 0 : i32
    return %c0_i32, %c0_i32_0, %c0_i32_1 : i32, i32, i32
  }
  func.func @transform_3(%arg0: i32, %arg1: memref<1xi32, #tpu.memory_space<smem>>) -> i32 {
    %c0_i32 = arith.constant 0 : i32
    %c0_i32_0 = arith.constant 0 : i32
    return %c0_i32 : i32
  }
}

</mosaic_0001>

<bundles_post_ra>
// kernel: _fused_losses.1
= control target key start
LH: loop header
LB: loop body
LE: loop exit
PB: predicated region body
PF: predicated region fallthrough
CT: control target
= control target key end

     0   :  { %v39_v2 = vlaneseq  ;;  %v587_v3 = vmov 0   ;;  %s810_s0 = inlined_call_operand.<no memory space> [shape: s32[1], index: 0, kind: input, shape index: {}]   ;;  %s811_s1 = inlined_call_operand.vmem [shape: f32[3,16,128], index: 1, kind: input, shape index: {}]   ;;  %s812_s2 = inlined_call_operand.vmem [shape: s32[3,1,128], index: 2, kind: input, shape index: {}]   ;;  %s813_s3 = inlined_call_operand.vmem [shape: f32[3,16,1], index: 3, kind: input, shape index: {}]   ;;  %s814_s4 = inlined_call_operand.hbm [shape: f32[6], index: 4, kind: output, shape index: {}]  }
   0x1   :  { %v491_v0 = vld [vmem:[%s813_s3 + $0x10] sm:$0xff]  ;;  %v47_v1 = vld [vmem:[%s813_s3] sm:$0xff]  ;;  %548 = vset.pattern.permute.xlu1 %v587_v3  ;;  %547 = vset.pattern.permute.xlu0 %v587_v3  ;;  %v492_v4 = vld [vmem:[%s813_s3 + $0x18] sm:$0xff] }
   0x2   :  { %v48_v5 = vld [vmem:[%s813_s3 + $0x8] sm:$0xff]  ;;  %223 = vperm.xlu1 %548, %v491_v0   ;;  %94 = vperm.xlu0 %547, %v47_v1   ;;  %v630_v6 = vld [vmem:[%s811_s1 + $0x10] sm:$0xff]  ;;  %v635_v7 = vld [vmem:[%s812_s2 + $0x1] sm:$0x1]  ;;  %v40_v8 = vshrl.u32 %v39_v2, 7 }
   0x3   :  { %v640_v9 = vld [vmem:[%s811_s1] sm:$0xff]  ;;  %v650_v11 = vld [vmem:[%s811_s1 + $0x18] sm:$0xff]  ;;  %v655_v12 = vld [vmem:[%s811_s1 + $0x8] sm:$0xff] }
   0x4   :  { %v645_v10 = vld [vmem:[%s812_s2] sm:$0x1]  ;;  %v73_v13 = vsub.s32 0, %v40_v8  ;;  %v178_v14 = vmax.f32 %v630_v6, %v650_v11  ;;  %v49_v15 = vmax.f32 %v640_v9, %v655_v12  ;;  %v664_v16 = vld [vmem:[%s811_s1 + $0x28] sm:$0xff]  ;;  %v669_v17 = vld [vmem:[%s812_s2 + $0x2] sm:$0x1] }
   0x5   :  { %v674_v18 = vld [vmem:[%s811_s1 + $0x20] sm:$0xff]  ;;  %v41_v19 = vadd.s32 8, %v40_v8 }
   0x6   :  { %v306_v20 = vmax.f32 %v674_v18, %v664_v16 }
   0x7   :  { %10 = vsyncpa [#allocation6], 0  ;;  %228 = vperm.xlu1 %548, %v492_v4   ;;  %99 = vperm.xlu0 %547, %v48_v5   ;;  %v203_v21 = vrot.slane %v635_v7, %v73_v13  ;;  %v74_v22 = vrot.slane %v645_v10, %v73_v13  ;;  %v179_v23 = vrot.slane %v178_v14, 4  ;;  %v50_v24 = vrot.slane %v49_v15, 4  ;;  %v503_v25 = vld [vmem:[%s813_s3 + $0x28] sm:$0xff]  ;;  %v502_v26 = vld [vmem:[%s813_s3 + $0x20] sm:$0xff]  ;;  %s430_s18 = scvt.s32.f32 %s810_s0 }
   0x8   :  { %v331_v27 = vrot.slane %v669_v17, %v73_v13  ;;  %v307_v28 = vrot.slane %v306_v20, 4  ;;  %v588_v30 = vmov 0.0   ;;  %v42_v57 = vcvt.s32.f32 %v40_v8  ;;  %s575_s13 = scalar_lea.hbm %s814_s4, 16 }
   0x9   :  { %vm204_vm0 = vcmp.eq.s32.totalorder %v40_v8, %v203_v21  ;;  %vm75_vm1 = vcmp.eq.s32.totalorder %v40_v8, %v74_v22  ;;  %v180_v29 = vmax.f32 %v178_v14, %v179_v23  ;;  %vm205_vm2 = vcmp.eq.s32.totalorder %v41_v19, %v203_v21  ;;  %p576_p0 = scmp.ne.s32.totalorder %s814_s4, %s575_s13  ;;  %p579_p1 = scmp.lt.u32.totalorder %s575_s13, %s814_s4 }
   0xa   :  { %v688_v31 = vsel %vm204_vm0, 1.0, %v588_v30  ;;  %v691_v32 = vsel %vm75_vm1, 1.0, %v588_v30  ;;  %v694_v33 = vsel %vm205_vm2, 1.0, %v588_v30  ;;  %v51_v34 = vmax.f32 %v49_v15, %v50_v24 }
   0xb   :  { %356 = vperm.xlu1 %548, %v503_v25   ;;  %351 = vperm.xlu0 %547, %v502_v26   ;;  %v210_v35 = vmul.f32 %v688_v31, %v630_v6  ;;  %v81_v36 = vmul.f32 %v691_v32, %v640_v9  ;;  %v181_v37 = vrot.slane %v180_v29, 2  ;;  %v211_v38 = vmul.f32 %v694_v33, %v650_v11  ;;  %p581_p2 = pnand %p579_p1, %p576_p0 }
   0xc   :  { %v52_v39 = vrot.slane %v51_v34, 2  ;;  %vm76_vm3 = vcmp.eq.s32.totalorder %v41_v19, %v74_v22  ;;  %vm333_vm4 = vcmp.eq.s32.totalorder %v41_v19, %v331_v27  ;;  %v308_v40 = vmax.f32 %v306_v20, %v307_v28 }
   0xd   :  { %v182_v41 = vmax.f32 %v180_v29, %v181_v37  ;;  %v702_v42 = vadd.f32 %v211_v38, %v210_v35  ;;  %v705_v43 = vsel %vm76_vm3, 1.0, %v588_v30  ;;  %v708_v44 = vsel %vm333_vm4, 1.0, %v588_v30 }
   0xe   :  { %v53_v45 = vmax.f32 %v51_v34, %v52_v39  ;;  %v82_v46 = vmul.f32 %v705_v43, %v655_v12  ;;  %v309_v47 = vrot.slane %v308_v40, 2  ;;  %vm332_vm5 = vcmp.eq.s32.totalorder %v40_v8, %v331_v27 }
   0xf   :  { %v183_v48 = vrot.slane %v182_v41, 1  ;;  %v715_v51 = vsel %vm332_vm5, 1.0, %v588_v30  ;;  %v339_v53 = vmul.f32 %v708_v44, %v664_v16  ;;  %v43_v58 = vcvt.s32.f32 %v41_v19 }
  0x10   :  { %v54_v49 = vrot.slane %v53_v45, 1  ;;  %v712_v50 = vadd.f32 %v82_v46, %v81_v36  ;;  %v310_v54 = vmax.f32 %v308_v40, %v309_v47  ;;  %v338_v55 = vmul.f32 %v715_v51, %v674_v18 }
  0x11   :  { %v717_v52 = vmax.f32 %v182_v41, %v183_v48  ;;  %v122_v28 = vcvt.s32.f32 %v645_v10  ;;  %v251_v38 = vcvt.s32.f32 %v635_v7  ;;  %vm128_vm12 = vcmask 1040384  }
  0x12   :  { %v723_v56 = vmax.f32 %v53_v45, %v54_v49  ;;  %v311_v63 = vrot.slane %v310_v54, 1  ;;  %v735_v0 = vadd.f32 %v339_v53, %v338_v55 }
  0x13   :  { %v185_v59 = vsub.f32 %v630_v6, %v717_v52  ;;  %v186_v60 = vsub.f32 %v650_v11, %v717_v52  ;;  %vm241_vm8 = vcmp.eq.f32.partialorder %v650_v11, %v717_v52  ;;  %vm240_vm9 = vcmp.eq.f32.partialorder %v630_v6, %v717_v52 }
  0x14   :  { %v56_v61 = vsub.f32 %v640_v9, %v723_v56  ;;  %v57_v62 = vsub.f32 %v655_v12, %v723_v56  ;;  %vm112_vm6 = vcmp.eq.f32.partialorder %v655_v12, %v723_v56  ;;  %vm111_vm7 = vcmp.eq.f32.partialorder %v640_v9, %v723_v56 }
  0x15   :  { %v113_v2 = vsel %vm111_vm7, %v42_v57, 16.0  ;;  %v114_v3 = vsel %vm112_vm6, %v43_v58, 16.0  ;;  %v189_v4 = vmul.f32 1.442695, %v186_v60  ;;  %v242_v8 = vsel %vm240_vm9, %v42_v57, 16.0 }
  0x16   :  { %v60_v1 = vmul.f32 1.442695, %v57_v62  ;;  %v115_v5 = vmin.f32 %v113_v2, %v114_v3  ;;  %v243_v13 = vsel %vm241_vm8, %v43_v58, 16.0  ;;  %v58_v12 = vmul.f32 1.442695, %v56_v61 }
  0x17   :  { %v743_v14 = vmax.f32 %v310_v54, %v311_v63  ;;  %v244_v19 = vmin.f32 %v242_v8, %v243_v13  ;;  %v187_v9 = vmul.f32 1.442695, %v185_v59  ;;  %v379_v59 = vcvt.s32.f32 %v669_v17 }
  0x18   :  { %549 = vpow2.f32 %v60_v1  ;;  %v116_v15 = vrot.slane %v115_v5, 4  ;;  %v84_v62 = vrot.slane %v712_v50, 4  ;;  %v213_v2 = vrot.slane %v702_v42, 4 }
  0x19   :  { %551 = vpow2.f32 %v189_v4  ;;  %vm368_vm10 = vcmp.eq.f32.partialorder %v674_v18, %v743_v14  ;;  %v245_v20 = vrot.slane %v244_v19, 4  ;;  %vm369_vm11 = vcmp.eq.f32.partialorder %v664_v16, %v743_v14 }
  0x1a   :  { %v117_v11 = vmin.f32 %v115_v5, %v116_v15  ;;  %553 = vpow2.f32 %v58_v12  ;;  %v370_v22 = vsel %vm368_vm10, %v42_v57, 16.0  ;;  %v371_v23 = vsel %vm369_vm11, %v43_v58, 16.0 }
  0x1b   :  { %555 = vpow2.f32 %v187_v9  ;;  %v246_v21 = vmin.f32 %v244_v19, %v245_v20  ;;  %v372_v26 = vmin.f32 %v370_v22, %v371_v23  ;;  %v85_v13 = vadd.f32 %v84_v62, %v712_v50 }
  0x1c   :  { %v118_v6 = vrot.slane %v117_v11, 2  ;;  %v214_v12 = vadd.f32 %v213_v2, %v702_v42 }
  0x1d   :  { %v247_v25 = vrot.slane %v246_v21, 2  ;;  %v373_v34 = vrot.slane %v372_v26, 4 }
  0x1e   :  { %v119_v24 = vmin.f32 %v117_v11, %v118_v6  ;;  %v86_v11 = vrot.slane %v85_v13, 2  ;;  %v215_v6 = vrot.slane %v214_v12, 2 }
  0x1f   :  { %v248_v29 = vmin.f32 %v246_v21, %v247_v25  ;;  %v374_v39 = vmin.f32 %v372_v26, %v373_v34 }
  0x20   :  { %v120_v27 = vrot.slane %v119_v24, 1  ;;  %v87_v21 = vadd.f32 %v86_v11, %v85_v13  ;;  %v216_v22 = vadd.f32 %v215_v6, %v214_v12 }
  0x21   :  { %v249_v37 = vrot.slane %v248_v29, 1  ;;  %v375_v46 = vrot.slane %v374_v39, 2 }
  0x22   :  { %v550_v35 = vpop.eup %549  ;;  %v121_v36 = vmin.f32 %v119_v24, %v120_v27  ;;  %v88_v23 = vrot.slane %v87_v21, 1  ;;  %v217_v24 = vrot.slane %v216_v22, 1 }
  0x23   :  { %v552_v40 = vpop.eup %551  ;;  %v250_v45 = vmin.f32 %v248_v29, %v249_v37  ;;  %v376_v54 = vmin.f32 %v374_v39, %v375_v46  ;;  %v314_v37 = vsub.f32 %v664_v16, %v743_v14 }
  0x24   :  { %v554_v41 = vpop.eup %553  ;;  %vm123_vm13 = vcmp.eq.f32.partialorder %v121_v36, %v122_v28  ;;  %v763_v27 = vadd.f32 %v88_v23, %v87_v21  ;;  %v765_v28 = vadd.f32 %v217_v24, %v216_v22  ;;  %v313_v36 = vsub.f32 %v674_v18, %v743_v14 }
  0x25   :  { %v556_v47 = vpop.eup %555  ;;  %v485_v48 = vsel %vm123_vm13, 1.0, %v588_v30  ;;  %v62_v49 = vadd.f32 %v554_v41, %v550_v35  ;;  %vm252_vm14 = vcmp.eq.f32.partialorder %v250_v45, %v251_v38  ;;  %v377_v58 = vrot.slane %v376_v54, 1 }
  0x26   :  { %v157_v10 = vsel %vm128_vm12, %v485_v48, 0.0  ;;  %v191_v53 = vadd.f32 %v556_v47, %v552_v40  ;;  %v495_v55 = vsel %vm252_vm14, 1.0, %v588_v30  ;;  %v315_v38 = vmul.f32 1.442695, %v313_v36 }
  0x27   :  { %v63_v57 = vrot.slane %v62_v49, 4  ;;  %v285_v60 = vsel %vm128_vm12, %v495_v55, 0.0  ;;  %v378_v1 = vmin.f32 %v376_v54, %v377_v58  ;;  %v317_v39 = vmul.f32 1.442695, %v314_v37 }
  0x28   :  { %v192_v7 = vrot.slane %v191_v53, 4 }
  0x29   :  { %v64_v61 = vadd.f32 %v63_v57, %v62_v49  ;;  %vm380_vm15 = vcmp.eq.f32.partialorder %v378_v1, %v379_v59 }
  0x2a   :  { %158 = vadd.xlane.f32.xlu0 %v157_v10  ;;  %v193_v63 = vadd.f32 %v192_v7, %v191_v53  ;;  %v759_v8 = vsel %vm380_vm15, 1.0, %v588_v30  ;;  %v341_v10 = vrot.slane %v735_v0, 4 }
  0x2b   :  { %v65_v3 = vrot.slane %v64_v61, 2 }
  0x2c   :  { %v194_v4 = vrot.slane %v193_v63, 2  ;;  %v342_v16 = vadd.f32 %v341_v10, %v735_v0 }
  0x2d   :  { %v66_v5 = vadd.f32 %v65_v3, %v64_v61 }
  0x2e   :  { %286 = vadd.xlane.f32.xlu0 %v285_v60  ;;  %v195_v17 = vadd.f32 %v194_v4, %v193_v63  ;;  %v343_v60 = vrot.slane %v342_v16, 2 }
  0x2f   :  { %v67_v15 = vrot.slane %v66_v5, 1 }
  0x30   :  { %v196_v19 = vrot.slane %v195_v17, 1 }
  0x31   :  { %v68_v9 = vadd.f32 %v67_v15, %v66_v5 }
  0x32   :  { %v197_v20 = vadd.f32 %v196_v19, %v195_v17 }
  0x33   :  { %557 = vlog2.f32 %v68_v9 }
  0x34   :  { %559 = vlog2.f32 %v197_v20 }
  0x35   :  { %561 = vpow2.f32 %v315_v38 }
  0x36   :  { %563 = vpow2.f32 %v317_v39 }
  0x3d   :  { %v558_v25 = vpop.eup %557 }
  0x3e   :  { %v560_v30 = vpop.eup %559  ;;  %v70_v26 = vmul.f32 0.6931472, %v558_v25 }
  0x3f   :  { %v199_v50 = vmul.f32 0.6931472, %v560_v30  ;;  %v562_v40 = vpop.eup %561 }
  0x40   :  { %v90_v42 = vadd.f32 %v70_v26, %v723_v56  ;;  %v564_v41 = vpop.eup %563 }
  0x41   :  { %v219_v29 = vadd.f32 %v199_v50, %v717_v52  ;;  %v319_v45 = vadd.f32 %v564_v41, %v562_v40 }
  0x42   :  { %v91_v34 = vsub.f32 %v90_v42, %v763_v27 }
  0x43   :  { %v220_v35 = vsub.f32 %v219_v29, %v765_v28  ;;  %v320_v56 = vrot.slane %v319_v45, 4 }
  0x45   :  { %v321_v46 = vadd.f32 %v320_v56, %v319_v45 }
  0x47   :  { %v322_v52 = vrot.slane %v321_v46, 2 }
  0x49   :  { %v323_v47 = vadd.f32 %v322_v52, %v321_v46 }
  0x4b   :  { %v324_v48 = vrot.slane %v323_v47, 1 }
  0x4d   :  { %v325_v49 = vadd.f32 %v324_v48, %v323_v47 }
  0x4f   :  { %565 = vlog2.f32 %v325_v49 }
  0x59   :  { %v566_v5 = vpop.eup %565 }
  0x81   :  { %v224_v53 = vpop.permute.xlu1 %223  ;;  %v95_v18 = vpop.permute.xlu0 %94 }
  0x82   :  { %v231_v54 = vmul.f32 %v688_v31, %v224_v53  ;;  %v102_v7 = vmul.f32 %v691_v32, %v95_v18  ;;  %v344_v31 = vadd.f32 %v343_v60, %v342_v16 }
  0x84   :  { %v345_v19 = vrot.slane %v344_v31, 1 }
  0x86   :  { %v229_v55 = vpop.permute.xlu1 %228  ;;  %v100_v57 = vpop.permute.xlu0 %99  ;;  %v346_v23 = vadd.f32 %v345_v19, %v344_v31 }
  0x87   :  { %v232_v58 = vmul.f32 %v694_v33, %v229_v55  ;;  %v103_v59 = vmul.f32 %v705_v43, %v100_v57  ;;  %v327_v43 = vmul.f32 0.6931472, %v566_v5 }
  0x89   :  { %v233_v61 = vadd.f32 %v232_v58, %v231_v54  ;;  %v104_v62 = vadd.f32 %v103_v59, %v102_v7 }
  0x8a   :  { %v357_v63 = vpop.permute.xlu1 %356  ;;  %v352_v1 = vpop.permute.xlu0 %351 }
  0x8b   :  { %v234_v2 = vrot.slane %v233_v61, 4  ;;  %v105_v3 = vrot.slane %v104_v62, 4  ;;  %v360_v4 = vmul.f32 %v708_v44, %v357_v63  ;;  %v359_v0 = vmul.f32 %v715_v51, %v352_v1 }
  0x8c   :  { %v347_v44 = vadd.f32 %v327_v43, %v743_v14  ;;  %v431_v63 = vstv %s430_s18 }
  0x8d   :  { %v235_v13 = vadd.f32 %v234_v2, %v233_v61  ;;  %v106_v17 = vadd.f32 %v105_v3, %v104_v62  ;;  %v361_v32 = vadd.f32 %v360_v4, %v359_v0  ;;  %567 = vrcp.f32 %v431_v63 }
  0x8e   :  { %v348_v50 = vsub.f32 %v347_v44, %v346_v23 }
  0x8f   :  { %v362_v12 = vrot.slane %v361_v32, 4  ;;  %v107_v33 = vrot.slane %v106_v17, 2  ;;  %v236_v15 = vrot.slane %v235_v13, 2 }
  0x91   :  { %v363_v9 = vadd.f32 %v362_v12, %v361_v32  ;;  %v108_v11 = vadd.f32 %v107_v33, %v106_v17  ;;  %v237_v20 = vadd.f32 %v236_v15, %v235_v13 }
  0x93   :  { %v364_v6 = vrot.slane %v363_v9, 2  ;;  %v109_v21 = vrot.slane %v108_v11, 1  ;;  %v238_v22 = vrot.slane %v237_v20, 1 }
  0x95   :  { %v110_v51 = vadd.f32 %v109_v21, %v108_v11  ;;  %v239_v24 = vadd.f32 %v238_v22, %v237_v20  ;;  %v365_v25 = vadd.f32 %v364_v6, %v363_v9 }
  0x97   :  { %v143_v30 = vsel %vm128_vm12, %v110_v51, 0.0  ;;  %v127_v26 = vmul.f32 %v110_v51, %v91_v34  ;;  %v256_v27 = vmul.f32 %v239_v24, %v220_v35  ;;  %v366_v28 = vrot.slane %v365_v25, 1 }
  0x98   :  { %144 = vadd.xlane.f32.xlu1 %v143_v30  ;;  %v271_v36 = vsel %vm128_vm12, %v239_v24, 0.0  ;;  %v413_v35 = vsel %vm128_vm12, %v759_v8, 0.0 }
  0x99   :  { %v129_v42 = vsel %vm128_vm12, %v127_v26, 0.0  ;;  %v367_v29 = vadd.f32 %v366_v28, %v365_v25  ;;  %v257_v14 = vsel %vm128_vm12, %v256_v27, 0.0 }
  0x9a   :  { %130 = vadd.xlane.f32.xlu0 %v129_v42 }
  0x9b   :  { %v384_v37 = vmul.f32 %v367_v29, %v348_v50  ;;  %v399_v34 = vsel %vm128_vm12, %v367_v29, 0.0 }
  0x9c   :  { %272 = vadd.xlane.f32.xlu1 %v271_v36 }
  0x9d   :  { %v385_v38 = vsel %vm128_vm12, %v384_v37, 0.0 }
  0x9e   :  { %258 = vadd.xlane.f32.xlu0 %v257_v14 }
  0xa0   :  { %386 = vadd.xlane.f32.xlu1 %v385_v38 }
  0xa2   :  { %400 = vadd.xlane.f32.xlu0 %v399_v34 }
  0xa4   :  { %414 = vadd.xlane.f32.xlu1 %v413_v35  ;;  %v568_v35 = vpop.eup %567 }
  0xb7   :  { %v159_v39 = vpop.xlane.xlu0 %158 }
  0xb8   :  { %v160_v40 = vrot.slane %v159_v39, 4 }
  0xba   :  { %v161_v45 = vadd.f32 %v160_v40, %v159_v39 }
  0xbb   :  { %v287_v41 = vpop.xlane.xlu0 %286 }
  0xbc   :  { %v288_v56 = vrot.slane %v287_v41, 4  ;;  %v162_v47 = vrot.slane %v161_v45, 2 }
  0xbe   :  { %v289_v53 = vadd.f32 %v288_v56, %v287_v41  ;;  %v163_v57 = vadd.f32 %v162_v47, %v161_v45 }
  0xc0   :  { %v290_v61 = vrot.slane %v289_v53, 2  ;;  %v164_v5 = vrot.slane %v163_v57, 1 }
  0xc2   :  { %v291_v43 = vadd.f32 %v290_v61, %v289_v53  ;;  %v165_v21 = vadd.f32 %v164_v5, %v163_v57 }
  0xc4   :  { %v292_v30 = vrot.slane %v291_v43, 1 }
  0xc6   :  { %v293_v14 = vadd.f32 %v292_v30, %v291_v43 }
 0x125   :  { %v145_v46 = vpop.xlane.xlu1 %144 }
 0x126   :  { %v146_v52 = vrot.slane %v145_v46, 4 }
 0x127   :  { %v131_v48 = vpop.xlane.xlu0 %130 }
 0x128   :  { %v147_v49 = vadd.f32 %v146_v52, %v145_v46  ;;  %v132_v10 = vrot.slane %v131_v48, 4 }
 0x129   :  { %v273_v18 = vpop.xlane.xlu1 %272 }
 0x12a   :  { %v148_v8 = vrot.slane %v147_v49, 2  ;;  %v133_v16 = vadd.f32 %v132_v10, %v131_v48  ;;  %v274_v54 = vrot.slane %v273_v18, 4 }
 0x12b   :  { %v259_v55 = vpop.xlane.xlu0 %258 }
 0x12c   :  { %v134_v7 = vrot.slane %v133_v16, 2  ;;  %v275_v58 = vadd.f32 %v274_v54, %v273_v18  ;;  %v260_v59 = vrot.slane %v259_v55, 4  ;;  %v149_v60 = vadd.f32 %v148_v8, %v147_v49 }
 0x12d   :  { %v387_v62 = vpop.xlane.xlu1 %386 }
 0x12e   :  { %v276_v1 = vrot.slane %v275_v58, 2  ;;  %v261_v2 = vadd.f32 %v260_v59, %v259_v55  ;;  %v388_v3 = vrot.slane %v387_v62, 4  ;;  %v135_v4 = vadd.f32 %v134_v7, %v133_v16 }
 0x12f   :  { %v401_v0 = vpop.xlane.xlu0 %400  ;;  %v150_v31 = vrot.slane %v149_v60, 1 }
 0x130   :  { %v262_v13 = vrot.slane %v261_v2, 2  ;;  %v389_v17 = vadd.f32 %v388_v3, %v387_v62  ;;  %v402_v32 = vrot.slane %v401_v0, 4  ;;  %v136_v12 = vrot.slane %v135_v4, 1 }
 0x131   :  { %v415_v33 = vpop.xlane.xlu1 %414  ;;  %v277_v15 = vadd.f32 %v276_v1, %v275_v58  ;;  %v151_v6 = vadd.f32 %v150_v31, %v149_v60 }
 0x132   :  { %v390_v19 = vrot.slane %v389_v17, 2  ;;  %v403_v9 = vadd.f32 %v402_v32, %v401_v0  ;;  %v416_v11 = vrot.slane %v415_v33, 4  ;;  %v137_v20 = vadd.f32 %v136_v12, %v135_v4 }
 0x133   :  { %v263_v22 = vadd.f32 %v262_v13, %v261_v2  ;;  %v278_v51 = vrot.slane %v277_v15, 1 }
 0x134   :  { %v404_v23 = vrot.slane %v403_v9, 2  ;;  %v417_v44 = vadd.f32 %v416_v11, %v415_v33  ;;  %518 = vpush %v137_v20  ;;  %v391_v24 = vadd.f32 %v390_v19, %v389_v17 }
 0x135   :  { %520 = vpush %v151_v6  ;;  %v264_v25 = vrot.slane %v263_v22, 1  ;;  %v279_v29 = vadd.f32 %v278_v51, %v277_v15 }
 0x136   :  { %v405_v26 = vadd.f32 %v404_v23, %v403_v9  ;;  %v418_v27 = vrot.slane %v417_v44, 2  ;;  %522 = vpush %v165_v21  ;;  %v392_v50 = vrot.slane %v391_v24, 1 }
 0x137   :  { %v265_v28 = vadd.f32 %v264_v25, %v263_v22 }
 0x138   :  { %v419_v42 = vadd.f32 %v418_v27, %v417_v44  ;;  %v393_v36 = vadd.f32 %v392_v50, %v391_v24  ;;  %v406_v37 = vrot.slane %v405_v26, 1 }
 0x139   :  { %524 = vpush %v265_v28 }
 0x13a   :  { %526 = vpush %v279_v29  ;;  %v407_v38 = vadd.f32 %v406_v37, %v405_v26  ;;  %v420_v34 = vrot.slane %v419_v42, 1 }
 0x13b   :  { %528 = vpush %v293_v14 }
 0x13c   :  { %530 = vpush %v393_v36  ;;  %v421_v39 = vadd.f32 %v420_v34, %v419_v42 }
 0x13d   :  { %532 = vpush %v407_v38 }
 0x13e   :  { %534 = vpush %v421_v39 }
 0x13f   :  { %536 = vpush %v568_v35 }
 0x165   :  { %s795_s0 = spop %518 }
 0x166   :  { %s521_s19 = spop %520 }
 0x167   :  { %v436_v40 = vstv %s521_s19  ;;  %s523_s20 = spop %522 }
 0x168   :  { %569 = vrcp.f32 %v436_v40 }
 0x16a   :  { %s525_s21 = spop %524 }
 0x16b   :  { %s527_s22 = spop %526 }
 0x16c   :  { %v448_v41 = vstv %s527_s22  ;;  %s529_s23 = spop %528 }
 0x16d   :  { %571 = vrcp.f32 %v448_v41  ;;  %s531_s24 = spop %530 }
 0x16e   :  { %s533_s25 = spop %532 }
 0x16f   :  { %v460_v45 = vstv %s533_s25  ;;  %s535_s26 = spop %534 }
 0x170   :  { %573 = vrcp.f32 %v460_v45  ;;  %s537_s27 = spop %536 }
 0x171   :  { %s443_s28 = smul.f32 %s537_s27, %s523_s20 }
 0x172   :  { %v570_v56 = vpop.eup %569  ;;  %s455_s29 = smul.f32 %s537_s27, %s529_s23 }
 0x173   :  { %445 = sst [smem:[#allocation5 + $0x1]] %s443_s28  ;;  %s467_s30 = smul.f32 %s537_s27, %s535_s26  ;;  %538 = vpush %v570_v56 }
 0x174   :  { %457 = sst [smem:[#allocation5 + $0x3]] %s455_s29 }
 0x175   :  { %469 = sst [smem:[#allocation5 + $0x5]] %s467_s30 }
 0x177   :  { %v572_v46 = vpop.eup %571 }
 0x178   :  { %540 = vpush %v572_v46 }
 0x17a   :  { %v574_v52 = vpop.eup %573 }
 0x17b   :  { %542 = vpush %v574_v52 }
 0x1a4   :  { %s539_s5 = spop %538 }
 0x1a5   :  { %s439_s6 = smul.f32 %s539_s5, %s795_s0 }
 0x1a7   :  { %441 = sst [smem:[#allocation5]] %s439_s6 }
 0x1a9   :  { %s541_s7 = spop %540 }
 0x1aa   :  { %s451_s8 = smul.f32 %s541_s7, %s525_s21 }
 0x1ac   :  { %453 = sst [smem:[#allocation5 + $0x2]] %s451_s8  ;;  %s543_s9 = spop %542 }
 0x1ad   :  { %s463_s10 = smul.f32 %s543_s9, %s531_s24 }
 0x1af   :  { %465 = sst [smem:[#allocation5 + $0x4]] %s463_s10 }
 0x1b0   :  { %584 = shalt.err (!%p581_p2)
}
 0x1b1   :  { %s589_s1 = smov [#allocation5]  }
 0x1b2   :  { %477 = dma.smem_to_hbm %s589_s1, 16, %s814_s4, [#allocation6]  }
 0x1b3   :  { %585 = dma.done.wait [#allocation6], 16  }
 0x1b4   :  { %586 = vsyncadd [#allocation6], 4294967280 }
 0x1b5   :  { %481 = sfence }
 0x1b6   :  { %482 = vsyncpa [#allocation6], 1 }

</bundles_post_ra>
